<compile_context>
chip_gen: v5e
topology: v5e:2x2
jax: 0.10.0
libtpu: 0.0.40
codegen_flags: <defaults>
</compile_context>

<pallas_src>
import jax
import jax.numpy as jnp
from jax.experimental import pallas as pl
from jax.experimental.pallas import tpu as pltpu


def _round_up(n, m):
    return ((n + m - 1) // m) * m


# --------------------------------------------------------------------------------------
# Kernels
# --------------------------------------------------------------------------------------
def _mlp(x_ref, w1_ref, b1_ref, w2_ref, b2_ref, w3_ref, b3_ref):
    """Fused 3-layer MLP on one batch tile. Matmul operands in weight dtype, acc/bias/ReLU f32."""
    wdt = w1_ref.dtype
    x = x_ref[...].astype(wdt)                                   # cast in-VMEM (no HBM round-trip)
    h1 = jnp.dot(x, w1_ref[...], preferred_element_type=jnp.float32) + b1_ref[...]
    h1 = jnp.maximum(h1, 0.0)                                    # f32 elementwise (all generations)
    h2 = jnp.dot(h1.astype(wdt), w2_ref[...], preferred_element_type=jnp.float32) + b2_ref[...]
    h2 = jnp.maximum(h2, 0.0)
    q = jnp.dot(h2.astype(wdt), w3_ref[...], preferred_element_type=jnp.float32) + b3_ref[...]
    return q


def dqn_kernel(x_ref, w1_ref, b1_ref, w2_ref, b2_ref, w3_ref, b3_ref, q_ref):
    q = _mlp(x_ref, w1_ref, b1_ref, w2_ref, b2_ref, w3_ref, b3_ref)
    q_ref[...] = q.astype(q_ref.dtype)


def dqn_greedy_kernel(x_ref, w1_ref, b1_ref, w2_ref, b2_ref, w3_ref, b3_ref, q_ref, a_ref):
    q = _mlp(x_ref, w1_ref, b1_ref, w2_ref, b2_ref, w3_ref, b3_ref)
    q_ref[...] = q.astype(q_ref.dtype)
    # Fused greedy action (first-max tie-break, matches jnp.argmax). No padded columns
    # exist here, so no -inf masking is needed.
    n_out = q.shape[1]
    idx = jax.lax.broadcasted_iota(jnp.int32, q.shape, 1)
    qmax = jnp.max(q, axis=-1, keepdims=True)
    cand = jnp.where(q == qmax, idx, n_out)
    a_ref[...] = jnp.min(cand, axis=-1, keepdims=True).astype(jnp.int32)


# --------------------------------------------------------------------------------------
# Host-side wrappers
# --------------------------------------------------------------------------------------
def prepare_params(params, param_dtype=jnp.float32):
    """One-time parameter prep (hoisted out of the per-step hot path).

    Casts the three weight matrices to `param_dtype` (bf16 halves their DMA bytes on
    every generation; accumulation stays f32). Biases stay f32. No output padding is
    needed anymore, so this is a no-op for param_dtype=float32.
    """
    w1, b1, w2, b2, w3, b3 = params
    cast = lambda w: w if w.dtype == param_dtype else w.astype(param_dtype)
    return (cast(w1), b1, cast(w2), b2, cast(w3), b3)


def dqn_forward(x, prepared_params, *, block_m=512, with_greedy=False):
    """Fused DQN forward on prepared params.

    Returns (batch, n_outputs) f32 Q-values, plus (batch,) int32 greedy actions when
    with_greedy=True.

    block_m is an upper bound on the batch tile; the actual tile is chosen so there are
    at least two grid steps when the batch allows it (v7x megacore sharding) and per-step
    overhead is amortized. This kernel is launch/DMA-bound, not MXU/VALU/VMEM-bound.
    """
    w1, b1, w2, b2, w3, b3 = prepared_params
    batch, n_in = x.shape
    hidden = w1.shape[1]
    n_out = w3.shape[1]

    # ---- batch tiling: >=2 tiles when possible, 8-row aligned, capped at block_m ------
    bm = min(block_m, max(8, _round_up(pl.cdiv(batch, 2), 8)))
    pad_b = _round_up(batch, bm)
    if pad_b != batch:
        # TODO(synk): callers can avoid this tiny pad launch by allocating replay
        # batches as a multiple of the tile size upstream.
        x = jnp.pad(x, ((0, pad_b - batch), (0, 0)))
    grid_m = pad_b // bm

    resident = lambda a: pl.BlockSpec(a.shape, lambda i: (0,) * a.ndim)

    # ---- scheduler hint (actual operand widths, incl. bf16 weights) -------------------
    w_bytes = jnp.dtype(w1.dtype).itemsize
    flops = 2 * pad_b * (n_in * hidden + hidden * hidden + hidden * n_out)
    bytes_accessed = (
        pad_b * n_in * x.dtype.itemsize
        + (w1.size + w2.size + w3.size) * w_bytes
        + (b1.size + b2.size + b3.size) * 4
        + pad_b * n_out * 4
        + (pad_b * 4 if with_greedy else 0)
    )

    in_specs = [
        pl.BlockSpec((bm, n_in), lambda i: (i, 0)),   # x: tiled over batch
        resident(w1), resident(b1),                   # weights/biases: VMEM-resident
        resident(w2), resident(b2),
        resident(w3), resident(b3),
    ]

    if with_greedy:
        kernel = dqn_greedy_kernel
        out_shape = (
            jax.ShapeDtypeStruct((pad_b, n_out), jnp.float32),
            jax.ShapeDtypeStruct((pad_b, 1), jnp.int32),
        )
        out_specs = (
            pl.BlockSpec((bm, n_out), lambda i: (i, 0)),
            pl.BlockSpec((bm, 1), lambda i: (i, 0)),
        )
    else:
        kernel = dqn_kernel
        out_shape = jax.ShapeDtypeStruct((pad_b, n_out), jnp.float32)
        out_specs = pl.BlockSpec((bm, n_out), lambda i: (i, 0))

    out = pl.pallas_call(
        kernel,
        out_shape=out_shape,
        grid_spec=pltpu.PrefetchScalarGridSpec(
            num_scalar_prefetch=0,
            grid=(grid_m,),
            in_specs=in_specs,
            out_specs=out_specs,
        ),
        compiler_params=pltpu.CompilerParams(
            dimension_semantics=("parallel",),        # v7x: shard batch tiles over 2 TCs
        ),
        cost_estimate=pl.CostEstimate(
            flops=flops, transcendentals=0, bytes_accessed=bytes_accessed
        ),
    )(x, w1, b1, w2, b2, w3, b3)

    if with_greedy:
        q, a = out
        return q[:batch], a[:batch, 0]
    return out[:batch]

    # TODO(synk): training-path fusion (gather Q[a] with scalar-prefetched action
    # indices + TD-target) is left to the caller.


def init_dqn_params(key, n_inputs, n_outputs, hidden=32):
    """Deterministic init mimicking PyTorch nn.Linear default U[-1/sqrt(fan_in), 1/sqrt(fan_in)]."""
    keys = jax.random.split(key, 6)

    def linear(kw, kb, fan_in, fan_out):
        bound = 1.0 / jnp.sqrt(jnp.float32(fan_in))
        w = jax.random.uniform(kw, (fan_in, fan_out), jnp.float32, -bound, bound)
        b = jax.random.uniform(kb, (1, fan_out), jnp.float32, -bound, bound)
        return w, b

    w1, b1 = linear(keys[0], keys[1], n_inputs, hidden)
    w2, b2 = linear(keys[2], keys[3], hidden, hidden)
    w3, b3 = linear(keys[4], keys[5], hidden, n_outputs)
    return (w1, b1, w2, b2, w3, b3)


def _ref_forward(x, params):
    w1, b1, w2, b2, w3, b3 = params
    h = jnp.maximum(x @ w1 + b1, 0.0)
    h = jnp.maximum(h @ w2 + b2, 0.0)
    return h @ w3 + b3


if __name__ == "__main__":
    key = jax.random.PRNGKey(0)
    k_x, k_p, k_x2 = jax.random.split(key, 3)

    n_inputs, n_outputs, hidden = 4, 2, 32   # CartPole-style state/action dims
    params = init_dqn_params(k_p, n_inputs, n_outputs, hidden=hidden)

    # f32 prepared params (no-op prep; matches the PyTorch reference numerics).
    prep_f32 = prepare_params(params, jnp.float32)

    # Small inference-style batch (single grid tile).
    batch = 8
    x = jax.random.normal(k_x, (batch, n_inputs), dtype=jnp.float32)
    out = jax.block_until_ready(dqn_forward(x, prep_f32))
    ref = _ref_forward(x, params)
    assert out.shape == (batch, n_outputs)
    assert jnp.allclose(out, ref, atol=1e-5, rtol=1e-5)

    # Replay-buffer-style batch: bm=152 -> 2 tiles (one per v7x core) + 4 padded rows.
    batch2 = 300
    x2 = jax.random.normal(k_x2, (batch2, n_inputs), dtype=jnp.float32)
    out2 = jax.block_until_ready(dqn_forward(x2, prep_f32))
    ref2 = _ref_forward(x2, params)
    assert out2.shape == (batch2, n_outputs)
    assert jnp.allclose(out2, ref2, atol=1e-5, rtol=1e-5)

    # Acting path: fused greedy action (no separate argmax kernel / Q re-read from HBM).
    q3, act3 = dqn_forward(x2, prep_f32, with_greedy=True)
    q3, act3 = jax.block_until_ready((q3, act3))
    assert q3.shape == (batch2, n_outputs) and act3.shape == (batch2,)
    assert jnp.allclose(q3, ref2, atol=1e-5, rtol=1e-5)
    assert jnp.array_equal(act3, jnp.argmax(ref2, axis=-1).astype(jnp.int32))

    # bf16 matmul-operand path (works on v5e/v6e/v7x; elementwise stays f32): loose check.
    prep_bf16 = prepare_params(params, jnp.bfloat16)
    out_bf = jax.block_until_ready(dqn_forward(x2, prep_bf16))
    assert out_bf.shape == (batch2, n_outputs)
    assert jnp.allclose(out_bf, ref2, atol=0.15, rtol=0.05)

    print("KERNEL_OK")
</pallas_src>

<mosaic_0001>
module attributes {stable_mosaic.version = 11 : i64} {
  func.func @dqn_kernel(%arg0: i32, %arg1: memref<8x4xf32, #tpu.memory_space<vmem>>, %arg2: memref<4x32xf32, #tpu.memory_space<vmem>>, %arg3: memref<1x32xf32, #tpu.memory_space<vmem>>, %arg4: memref<32x32xf32, #tpu.memory_space<vmem>>, %arg5: memref<1x32xf32, #tpu.memory_space<vmem>>, %arg6: memref<32x2xf32, #tpu.memory_space<vmem>>, %arg7: memref<1x2xf32, #tpu.memory_space<vmem>>, %arg8: memref<8x2xf32, #tpu.memory_space<vmem>>) attributes {dimension_semantics = [#tpu.dimension_semantics<parallel>], iteration_bounds = array<i64: 1>, scalar_prefetch = 0 : i64, scratch_operands = 0 : i64, tpu.core_type = #tpu.core_type<tc>, window_params = [{transform_indices = @transform_0, window_bounds = array<i64: 8, 4>}, {pipeline_mode = #tpu.pipeline_mode<synchronous>, transform_indices = @transform_1, window_bounds = array<i64: 4, 32>}, {pipeline_mode = #tpu.pipeline_mode<synchronous>, transform_indices = @transform_2, window_bounds = array<i64: 1, 32>}, {pipeline_mode = #tpu.pipeline_mode<synchronous>, transform_indices = @transform_3, window_bounds = array<i64: 32, 32>}, {pipeline_mode = #tpu.pipeline_mode<synchronous>, transform_indices = @transform_4, window_bounds = array<i64: 1, 32>}, {pipeline_mode = #tpu.pipeline_mode<synchronous>, transform_indices = @transform_5, window_bounds = array<i64: 32, 2>}, {pipeline_mode = #tpu.pipeline_mode<synchronous>, transform_indices = @transform_6, window_bounds = array<i64: 1, 2>}, {transform_indices = @transform_7, window_bounds = array<i64: 8, 2>}]} {
    %c0 = arith.constant 0 : index
    %c0_0 = arith.constant 0 : index
    %0 = vector.load %arg1[%c0, %c0_0] : memref<8x4xf32, #tpu.memory_space<vmem>>, vector<8x4xf32>
    %c0_1 = arith.constant 0 : index
    %c0_2 = arith.constant 0 : index
    %1 = vector.load %arg2[%c0_1, %c0_2] : memref<4x32xf32, #tpu.memory_space<vmem>>, vector<4x32xf32>
    %cst = arith.constant dense<0.000000e+00> : vector<8x32xf32>
    %2 = tpu.matmul %0, %1, %cst {dimension_numbers = #tpu.dot_dimension_numbers<[1], [0], [0], [1], [0, 0, 1, 1], [], []>} : vector<8x4xf32>, vector<4x32xf32>, vector<8x32xf32> -> vector<8x32xf32>
    %c0_3 = arith.constant 0 : index
    %c0_4 = arith.constant 0 : index
    %3 = vector.load %arg3[%c0_3, %c0_4] : memref<1x32xf32, #tpu.memory_space<vmem>>, vector<1x32xf32>
    %4 = vector.broadcast %3 : vector<1x32xf32> to vector<8x32xf32>
    %5 = arith.addf %2, %4 : vector<8x32xf32>
    %cst_5 = arith.constant 0.000000e+00 : f32
    %6 = vector.broadcast %cst_5 : f32 to vector<8x32xf32>
    %7 = arith.maximumf %5, %6 : vector<8x32xf32>
    %c0_6 = arith.constant 0 : index
    %c0_7 = arith.constant 0 : index
    %8 = vector.load %arg4[%c0_6, %c0_7] : memref<32x32xf32, #tpu.memory_space<vmem>>, vector<32x32xf32>
    %cst_8 = arith.constant dense<0.000000e+00> : vector<8x32xf32>
    %9 = tpu.matmul %7, %8, %cst_8 {dimension_numbers = #tpu.dot_dimension_numbers<[1], [0], [0], [1], [0, 0, 1, 1], [], []>} : vector<8x32xf32>, vector<32x32xf32>, vector<8x32xf32> -> vector<8x32xf32>
    %c0_9 = arith.constant 0 : index
    %c0_10 = arith.constant 0 : index
    %10 = vector.load %arg5[%c0_9, %c0_10] : memref<1x32xf32, #tpu.memory_space<vmem>>, vector<1x32xf32>
    %11 = vector.broadcast %10 : vector<1x32xf32> to vector<8x32xf32>
    %12 = arith.addf %9, %11 : vector<8x32xf32>
    %cst_11 = arith.constant 0.000000e+00 : f32
    %13 = vector.broadcast %cst_11 : f32 to vector<8x32xf32>
    %14 = arith.maximumf %12, %13 : vector<8x32xf32>
    %c0_12 = arith.constant 0 : index
    %c0_13 = arith.constant 0 : index
    %15 = vector.load %arg6[%c0_12, %c0_13] : memref<32x2xf32, #tpu.memory_space<vmem>>, vector<32x2xf32>
    %cst_14 = arith.constant dense<0.000000e+00> : vector<8x2xf32>
    %16 = tpu.matmul %14, %15, %cst_14 {dimension_numbers = #tpu.dot_dimension_numbers<[1], [0], [0], [1], [0, 0, 1, 1], [], []>} : vector<8x32xf32>, vector<32x2xf32>, vector<8x2xf32> -> vector<8x2xf32>
    %c0_15 = arith.constant 0 : index
    %c0_16 = arith.constant 0 : index
    %17 = vector.load %arg7[%c0_15, %c0_16] : memref<1x2xf32, #tpu.memory_space<vmem>>, vector<1x2xf32>
    %18 = vector.broadcast %17 : vector<1x2xf32> to vector<8x2xf32>
    %19 = arith.addf %16, %18 : vector<8x2xf32>
    %c0_17 = arith.constant 0 : index
    %c0_18 = arith.constant 0 : index
    %20 = vector.load %arg8[%c0_17, %c0_18] : memref<8x2xf32, #tpu.memory_space<vmem>>, vector<8x2xf32>
    tpu.vector_store %arg8[%c0_17, %c0_18], %19 {strides = array<i32>} : memref<8x2xf32, #tpu.memory_space<vmem>>, vector<8x2xf32>,
    return
  }
  func.func @transform_0(%arg0: i32) -> (i32, i32) {
    %c0_i32 = arith.constant 0 : i32
    %c0_i32_0 = arith.constant 0 : i32
    return %arg0, %c0_i32 : i32, i32
  }
  func.func @transform_1(%arg0: i32) -> (i32, i32) {
    %c0_i32 = arith.constant 0 : i32
    %c0_i32_0 = arith.constant 0 : i32
    %c0_i32_1 = arith.constant 0 : i32
    return %c0_i32, %c0_i32_0 : i32, i32
  }
  func.func @transform_2(%arg0: i32) -> (i32, i32) {
    %c0_i32 = arith.constant 0 : i32
    %c0_i32_0 = arith.constant 0 : i32
    %c0_i32_1 = arith.constant 0 : i32
    return %c0_i32, %c0_i32_0 : i32, i32
  }
  func.func @transform_3(%arg0: i32) -> (i32, i32) {
    %c0_i32 = arith.constant 0 : i32
    %c0_i32_0 = arith.constant 0 : i32
    %c0_i32_1 = arith.constant 0 : i32
    return %c0_i32, %c0_i32_0 : i32, i32
  }
  func.func @transform_4(%arg0: i32) -> (i32, i32) {
    %c0_i32 = arith.constant 0 : i32
    %c0_i32_0 = arith.constant 0 : i32
    %c0_i32_1 = arith.constant 0 : i32
    return %c0_i32, %c0_i32_0 : i32, i32
  }
  func.func @transform_5(%arg0: i32) -> (i32, i32) {
    %c0_i32 = arith.constant 0 : i32
    %c0_i32_0 = arith.constant 0 : i32
    %c0_i32_1 = arith.constant 0 : i32
    return %c0_i32, %c0_i32_0 : i32, i32
  }
  func.func @transform_6(%arg0: i32) -> (i32, i32) {
    %c0_i32 = arith.constant 0 : i32
    %c0_i32_0 = arith.constant 0 : i32
    %c0_i32_1 = arith.constant 0 : i32
    return %c0_i32, %c0_i32_0 : i32, i32
  }
  func.func @transform_7(%arg0: i32) -> (i32, i32) {
    %c0_i32 = arith.constant 0 : i32
    %c0_i32_0 = arith.constant 0 : i32
    return %arg0, %c0_i32 : i32, i32
  }
}

</mosaic_0001>

<bundles_post_ra>
// kernel: tpu_custom_call.1
= control target key start
LH: loop header
LB: loop body
LE: loop exit
PB: predicated region body
PF: predicated region fallthrough
CT: control target
= control target key end

     0   :  { %vm36_vm0 = vcmask 1043456   ;;  %vm32_vm1 = vcmask 31744   ;;  %vm69_vm2 = vcmask 261120   ;;  %vm125_vm3 = vcmask 15360   ;;  %s220_s1 = inlined_call_operand.vmem [shape: f32[4,32], index: 1, kind: input, shape index: {}]   ;;  %s221_s0 = inlined_call_operand.vmem [shape: f32[8,4], index: 0, kind: input, shape index: {}]   ;;  %s222_s3 = inlined_call_operand.vmem [shape: f32[32,32], index: 3, kind: input, shape index: {}]   ;;  %s223_s2 = inlined_call_operand.vmem [shape: f32[1,32], index: 2, kind: input, shape index: {}]   ;;  %s224_s4 = inlined_call_operand.vmem [shape: f32[1,32], index: 4, kind: input, shape index: {}]   ;;  %s225_s5 = inlined_call_operand.vmem [shape: f32[32,2], index: 5, kind: input, shape index: {}]   ;;  %s226_s6 = inlined_call_operand.vmem [shape: f32[1,2], index: 6, kind: input, shape index: {}]   ;;  %s227_s7 = inlined_call_operand.vmem [shape: f32[8,2], index: 7, kind: output, shape index: {}]  }
   0x1   :  { %v27_v0 = vld [vmem:[%s220_s1] sm:$0xf]  ;;  %v64_v2 = vld [vmem:[%s222_s3 + $0x18] sm:$0xff]  ;;  %v63_v3 = vld [vmem:[%s222_s3 + $0x10] sm:$0xff] }
   0x2   :  { %v26_v1 = vld [vmem:[%s221_s0] sm:$0xff]  ;;  %131 = vmatpush.msk.msra.mxu0 %vm36_vm0, %v27_v0  ;;  %85 = vmatpush.msra.mxu1 %v64_v2  ;;  %v62_v4 = vld [vmem:[%s222_s3 + $0x8] sm:$0xff]  ;;  %v97_v6 = vld [vmem:[%s225_s5 + $0x18] sm:$0xff] }
   0x3   :  { %132 = vmatmul.msk.f32.vlgmr.msra.gmra.mxu0 %vm32_vm1, %v26_v1  ;;  %v61_v5 = vld [vmem:[%s222_s3] sm:$0xff]  ;;  %117 = vmatpush.msra.mxu2 %v97_v6  ;;  %v96_v11 = vld [vmem:[%s225_s5 + $0x10] sm:$0xff]  ;;  %v95_v12 = vld [vmem:[%s225_s5 + $0x8] sm:$0xff] }
   0x4   :  { %86 = vmatpush.msra.mxu1 %v63_v3  ;;  %v135_v7 = vld [vmem:[%s223_s2] ss:$0 sm:$0xff] }
   0x5   :  { %118 = vmatpush.msra.mxu2 %v96_v11  ;;  %v94_v13 = vld [vmem:[%s225_s5] sm:$0xff] }
   0x6   :  { %87 = vmatpush.msra.mxu1 %v62_v4  ;;  %v136_v14 = vld [vmem:[%s224_s4] ss:$0 sm:$0xff] }
   0x7   :  { %119 = vmatpush.msra.mxu2 %v95_v12  ;;  %v137_v18 = vld [vmem:[%s226_s6] ss:$0 sm:$0xff] }
   0x8   :  { %88 = vmatpush.msra.mxu1 %v61_v5 }
   0x9   :  { %120 = vmatpush.msra.mxu2 %v94_v13 }
  0x80   :  { %v57_v8 = vpop.f32.mrf.mxu0 }
  0x81   :  { %v58_v9 = vadd.f32 %v135_v7, %v57_v8 }
  0x83   :  { %v60_v10 = vmax.f32 %v58_v9, 0.0 }
  0x85   :  { %133 = vmatmul.msk.f32.vlgmr.msra.gmra.mxu1 %vm69_vm2, %v60_v10 }
 0x102   :  { %v90_v15 = vpop.f32.mrf.mxu1 }
 0x103   :  { %v91_v16 = vadd.f32 %v136_v14, %v90_v15 }
 0x105   :  { %v93_v17 = vmax.f32 %v91_v16, 0.0 }
 0x107   :  { %134 = vmatmul.msk.f32.vlgmr.msra.gmra.mxu2 %vm69_vm2, %v93_v17 }
 0x18a   :  { %v122_v19 = vpop.f32.mrf.mxu2 }
 0x18b   :  { %v123_v20 = vadd.f32 %v137_v18, %v122_v19 }
 0x18d   :  { %126 = vst.msk [vmem:[%s227_s7] sm:$0xff] %vm125_vm3, %v123_v20 }

</bundles_post_ra>
